<compile_context>
chip_gen: v5e
topology: v5e:2x2
jax: 0.10.0
libtpu: 0.0.40
codegen_flags: <defaults>
</compile_context>

<pallas_src>
import jax
import jax.numpy as jnp
from jax.experimental import pallas as pl
from jax.experimental.pallas import tpu as pltpu


def _round_up(x, m):
    return (x + m - 1) // m * m


def _vmem_cap_bytes():
    """~60% of this generation's VMEM (64 MiB fallback ~= v7x)."""
    try:
        cap = int(getattr(pltpu.get_tpu_info(), "vmem_capacity_bytes", 64 << 20))
    except Exception:
        cap = 64 << 20
    return int(cap * 0.6)


def _pad_nodes(n):
    # Multiple of 512 so row/contraction tiles never degrade to 128.
    return _round_up(max(n, 512), 512)


def prepare_adjacency(adj):
    """Pad + bf16-cast the (constant) adjacency once; reuse across layers."""
    n = adj.shape[0]
    n_pad = _pad_nodes(n)
    return (jnp.zeros((n_pad, n_pad), jnp.bfloat16)
            .at[:n, :n].set(adj.astype(jnp.bfloat16)))


def _plan_aggregation(n_pad, f_pad, cap):
    """Pick (tm, tk, resident_support, footprint_bytes) under the VMEM cap."""
    tms = [t for t in (512, 256) if n_pad % t == 0 and n_pad // t >= 2]
    tks = [t for t in (2048, 1024, 512) if n_pad % t == 0]
    sup_resident = n_pad * f_pad * 2            # bf16 support, single copy
    for tm in tms:
        for tk in tks:
            # double-buffered adj tile + resident f32 out block + bias
            base = 2 * tm * tk * 2 + 2 * tm * f_pad * 4 + 2 * f_pad * 4
            if sup_resident <= (16 << 20) and base + sup_resident <= cap:
                return tm, tk, True, base + sup_resident
            if base + 2 * tk * f_pad * 2 <= cap:
                return tm, tk, False, base + 2 * tk * f_pad * 2
    tm, tk = tms[-1], 512
    return (tm, tk, False,
            2 * tm * tk * 2 + 2 * tm * f_pad * 4 + 2 * f_pad * 4
            + 2 * tk * f_pad * 2)


# --------------------------------------------------------------------------
# Kernel A: support = X @ W   (computed once; lane-dense padded F_out)
# --------------------------------------------------------------------------
def _support_kernel(x_ref, w_ref, s_ref):
    s_ref[...] = jnp.dot(
        x_ref[...], w_ref[...], preferred_element_type=jnp.float32
    ).astype(s_ref.dtype)


# --------------------------------------------------------------------------
# Kernel B: out = adj @ support + bias
#   - accumulates directly into the resident f32 output block (no scratch)
#   - support is either fully VMEM-resident (sliced by k) or k-streamed
# --------------------------------------------------------------------------
def _make_aggregate_kernel(tk, resident_support):
    def kernel(adj_ref, s_ref, b_ref, o_ref):
        k = pl.program_id(1)

        @pl.when(k == 0)
        def _init():
            # Seed the resident output block with the broadcast bias.
            o_ref[...] = jnp.broadcast_to(b_ref[...], o_ref.shape)

        if resident_support:
            start = pl.multiple_of(k * tk, tk)
            s_blk = s_ref[pl.ds(start, tk), :]
        else:
            s_blk = s_ref[...]

        o_ref[...] += jnp.dot(adj_ref[...], s_blk,
                              preferred_element_type=jnp.float32)

    return kernel


def graph_convolution(x, adj, weight, bias, *, out_dtype=jnp.float32):
    """Pallas GCN layer: adj @ (x @ weight) + bias.

    `adj` may be either the raw [N, N] adjacency or the result of
    `prepare_adjacency(adj)` (pre-padded bf16) -- the latter avoids the
    per-call pad+cast of the n^2 stream and should be reused across layers.
    """
    n, f_in = x.shape
    f_out = weight.shape[1]
    n_pad = _pad_nodes(n)
    f_pad = _round_up(f_out, 128)

    if adj.shape == (n_pad, n_pad) and adj.dtype == jnp.bfloat16:
        adj_p = adj                               # already prepared (cached)
    else:
        assert adj.shape == (n, n)
        adj_p = prepare_adjacency(adj)            # fallback: pad+cast per call

    cap = _vmem_cap_bytes()
    tm, tk, resident, _ = _plan_aggregation(n_pad, f_pad, cap)

    # bf16 streams, f32 accumulation on the MXU.
    # TODO(synk): adj could additionally be quantized (int8 on v5e/v6e, fp8 on
    # v7x) with a per-row scale folded in at finalize for another ~2x on the
    # HBM-bound adj stream; kept bf16 here for accuracy/simplicity.
    x_p = jnp.zeros((n_pad, f_in), jnp.bfloat16).at[:n, :].set(
        x.astype(jnp.bfloat16))
    w_p = jnp.zeros((f_in, f_pad), jnp.bfloat16).at[:, :f_out].set(
        weight.astype(jnp.bfloat16))
    b_p = jnp.zeros((1, f_pad), jnp.float32).at[0, :f_out].set(
        bias.astype(jnp.float32))

    # ---- Kernel A: support = X @ W (once, not per output tile) ------------
    # TODO(synk): for very large f_in/f_out, tile over f_pad and K-reduce over
    # f_in (same accumulator pattern as kernel B); fine for typical GCN widths.
    support = pl.pallas_call(
        _support_kernel,
        out_shape=jax.ShapeDtypeStruct((n_pad, f_pad), jnp.bfloat16),
        grid_spec=pltpu.PrefetchScalarGridSpec(
            num_scalar_prefetch=0,
            grid=(n_pad // tm,),
            in_specs=[
                pl.BlockSpec((tm, f_in), lambda i: (i, 0)),
                pl.BlockSpec((f_in, f_pad), lambda i: (0, 0)),
            ],
            out_specs=pl.BlockSpec((tm, f_pad), lambda i: (i, 0)),
        ),
        compiler_params=pltpu.CompilerParams(
            dimension_semantics=("parallel",),
            vmem_limit_bytes=cap,
        ),
    )(x_p, w_p)

    # ---- Kernel B: out = adj @ support + bias ------------------------------
    if resident:
        # Constant block index -> support loaded to VMEM once, never re-DMA'd.
        support_spec = pl.BlockSpec((n_pad, f_pad), lambda i, k: (0, 0))
    else:
        support_spec = pl.BlockSpec((tk, f_pad), lambda i, k: (k, 0))

    out_p = pl.pallas_call(
        _make_aggregate_kernel(tk, resident),
        out_shape=jax.ShapeDtypeStruct((n_pad, f_pad), jnp.float32),
        grid_spec=pltpu.PrefetchScalarGridSpec(
            num_scalar_prefetch=0,
            grid=(n_pad // tm, n_pad // tk),      # reduction axis last
            in_specs=[
                pl.BlockSpec((tm, tk), lambda i, k: (i, k)),      # adj tile
                support_spec,                                      # support
                pl.BlockSpec((1, f_pad), lambda i, k: (0, 0)),     # bias
            ],
            out_specs=pl.BlockSpec((tm, f_pad), lambda i, k: (i, 0)),
        ),
        compiler_params=pltpu.CompilerParams(
            dimension_semantics=("parallel", "arbitrary"),
            vmem_limit_bytes=cap,
        ),
    )(adj_p, support, b_p)

    return out_p[:n, :f_out].astype(out_dtype)


if __name__ == "__main__":
    # Small shapes: N nodes, F_in -> F_out features.
    N, F_IN, F_OUT = 64, 32, 16

    key = jax.random.PRNGKey(0)
    k_x, k_adj, k_w = jax.random.split(key, 3)

    # Deterministic parameter init mirroring reset_parameters():
    #   weight ~ U(-stdv, stdv), stdv = 1/sqrt(out_features); bias = 0
    stdv = 1.0 / (F_OUT ** 0.5)
    weight = jax.random.uniform(
        k_w, (F_IN, F_OUT), dtype=jnp.float32, minval=-stdv, maxval=stdv
    )
    bias = jnp.zeros((F_OUT,), dtype=jnp.float32)

    # Inputs: node features + a dense row-normalized adjacency.
    # TODO(synk): torch.spmm is sparse; adj is handled as a dense matrix here.
    x = jax.random.normal(k_x, (N, F_IN), dtype=jnp.float32)
    adj_raw = (jax.random.uniform(k_adj, (N, N)) < 0.2).astype(jnp.float32)
    adj_raw = adj_raw + jnp.eye(N, dtype=jnp.float32)          # self loops
    adj = adj_raw / jnp.sum(adj_raw, axis=1, keepdims=True)    # row-normalize

    # Pad + bf16-cast the adjacency ONCE; reuse across layers / calls.
    adj_prepared = prepare_adjacency(adj)

    out = graph_convolution(x, adj_prepared, weight, bias)
    out = jax.block_until_ready(out)

    # Reference check (plain JAX f32). bf16 input streams -> loose tolerance.
    ref = adj @ (x @ weight) + bias
    assert out.shape == (N, F_OUT)
    assert jnp.allclose(out, ref, atol=2e-2, rtol=2e-2), "mismatch vs reference"

    print("KERNEL_OK")
</pallas_src>

<mosaic_0001>
module attributes {stable_mosaic.version = 11 : i64} {
  func.func @_support_kernel(%arg0: i32, %arg1: memref<256x32xbf16, #tpu.memory_space<vmem>>, %arg2: memref<32x128xbf16, #tpu.memory_space<vmem>>, %arg3: memref<256x128xbf16, #tpu.memory_space<vmem>>) attributes {dimension_semantics = [#tpu.dimension_semantics<parallel>], iteration_bounds = array<i64: 2>, scalar_prefetch = 0 : i64, scratch_operands = 0 : i64, tpu.core_type = #tpu.core_type<tc>, window_params = [{transform_indices = @transform_0, window_bounds = array<i64: 256, 32>}, {pipeline_mode = #tpu.pipeline_mode<synchronous>, transform_indices = @transform_1, window_bounds = array<i64: 32, 128>}, {transform_indices = @transform_2, window_bounds = array<i64: 256, 128>}]} {
    %c0 = arith.constant 0 : index
    %c0_0 = arith.constant 0 : index
    %0 = vector.load %arg1[%c0, %c0_0] : memref<256x32xbf16, #tpu.memory_space<vmem>>, vector<256x32xbf16>
    %c0_1 = arith.constant 0 : index
    %c0_2 = arith.constant 0 : index
    %1 = vector.load %arg2[%c0_1, %c0_2] : memref<32x128xbf16, #tpu.memory_space<vmem>>, vector<32x128xbf16>
    %cst = arith.constant dense<0.000000e+00> : vector<256x128xf32>
    %2 = tpu.matmul %0, %1, %cst {dimension_numbers = #tpu.dot_dimension_numbers<[1], [0], [0], [1], [0, 0, 1, 1], [], []>} : vector<256x32xbf16>, vector<32x128xbf16>, vector<256x128xf32> -> vector<256x128xf32>
    %3 = arith.truncf %2 : vector<256x128xf32> to vector<256x128xbf16>
    %c0_3 = arith.constant 0 : index
    %c0_4 = arith.constant 0 : index
    %4 = vector.load %arg3[%c0_3, %c0_4] : memref<256x128xbf16, #tpu.memory_space<vmem>>, vector<256x128xbf16>
    tpu.vector_store %arg3[%c0_3, %c0_4], %3 {strides = array<i32>} : memref<256x128xbf16, #tpu.memory_space<vmem>>, vector<256x128xbf16>,
    return
  }
  func.func @transform_0(%arg0: i32) -> (i32, i32) {
    %c0_i32 = arith.constant 0 : i32
    %c0_i32_0 = arith.constant 0 : i32
    return %arg0, %c0_i32 : i32, i32
  }
  func.func @transform_1(%arg0: i32) -> (i32, i32) {
    %c0_i32 = arith.constant 0 : i32
    %c0_i32_0 = arith.constant 0 : i32
    %c0_i32_1 = arith.constant 0 : i32
    return %c0_i32, %c0_i32_0 : i32, i32
  }
  func.func @transform_2(%arg0: i32) -> (i32, i32) {
    %c0_i32 = arith.constant 0 : i32
    %c0_i32_0 = arith.constant 0 : i32
    return %arg0, %c0_i32 : i32, i32
  }
}

</mosaic_0001>

<bundles_post_ra>
// kernel: tpu_custom_call.1
= control target key start
LH: loop header
LB: loop body
LE: loop exit
PB: predicated region body
PF: predicated region fallthrough
CT: control target
= control target key end

     0   :  { %7 = vsyncpa [#allocation3], 0  ;;  %s1043_s0 = inlined_call_operand.vmem [shape: bf16[512,32], index: 0, kind: input, shape index: {}]   ;;  %s1044_s1 = inlined_call_operand.vmem [shape: bf16[32,128], index: 1, kind: input, shape index: {}]   ;;  %s1045_s2 = inlined_call_operand.hbm [shape: bf16[512,128], index: 2, kind: output, shape index: {}]  }
   0x1   :  { %9 = vsyncpa [#allocation3 + $0x1], 0  ;;  %s896_s9 = smov 0   ;;  %s898_s10 = smov 0  }
   0x2   :  { %s900_s11 = smov 0   ;;  %s902_s12 = smov 0  }
   0x3 LB: > { %s917_s13 = sadd.s32 4294967295, %s877_s12   ;;  %s554_s14 = sadd.s32 4294967294, %s877_s12   ;;  %s877_s12 = sphi %s902_s12, %s1051_s12   ;;  %s873_s11 = sphi %s900_s11, %s1050_s11   ;;  %s869_s10 = sphi %s898_s10, %s1049_s10   ;;  %s865_s9 = sphi %s896_s9, %s1048_s9  }
   0x4   : > { %s921_s15 = sadd.s32 1, %s877_s12   ;;  %s69_s16 = sadd.s32 1, %s873_s11 }
   0x5   : > { %s66_s17 = ssub.s32 %s877_s12, %s921_s15  ;;  %p79_p0 = scmp.ne.s32.totalorder %s873_s11, %s869_s10 }
   0x6   : > { %p67_p1 = scmp.eq.s32.totalorder %s66_s17, 0  ;;  %p80_p2 = scmp.eq.s32.totalorder %s917_s13, 1 }
   0x7   : > { %p85_p3 = scmp.ne.s32.totalorder %s869_s10, %s865_s9  ;;  %p86_p4 = scmp.eq.s32.totalorder %s554_s14, 1 }
   0x8   : > { %s932_s18 = scalar_select %p67_p1, %s873_s11, %s69_s16  }
   0x9   : > { %p934_p5 = por %p80_p2, %p79_p0  ;;  %p938_p6 = por %p86_p4, %p85_p3 }
   0xa   : > { %p557_p7 = scmp.ge.s32.totalorder %s877_s12, 1  ;;  %p116_p8 = scmp.lt.s32.totalorder %s877_s12, 3 }
   0xc   : > { %p117_p9 = pnand %p557_p7, %p116_p8 }
   0xd   : > { %s559_s23 = sshll.u32 (!%p117_p9), %s917_s13, 5  ;;  %s135_s30 = sand.u32 (!%p117_p9), 1, %s869_s10  }
   0xe   : > { %120 = sbr.rel (%p117_p9) target bundleno = 223 (0xdf), region = 28  ;;  %p139_p10 = scmp.lt.s32.totalorder (!%p117_p9), %s559_s23, 63 }
   0xf   : > { %s558_s3 = sshll.u32 (!%p117_p9), %s135_s30, 7  ;;  %s672_s5 = sshll.u32 (!%p117_p9), %s917_s13, 7 }
  0x10   : > { %s991_s4 = scalar_lea.vmem (!%p117_p9), [#allocation2], %s558_s3  ;;  %s488_s8 = scalar_lea.hbm (!%p117_p9), %s1045_s2, %s672_s5 }
  0x11   : > { %s489_s14 = sshll.u32 (!%p117_p9), %s991_s4, 4  ;;  %s491_s16 = sshll.u32 (!%p117_p9), %s488_s8, 4  ;;  %s490_s14 = int_to_ptr.vmem [resolvable:$true] %s489_s14  ;;  %s492_s16 = int_to_ptr.hbm [resolvable:$true] %s491_s16 }
  0x12   : > { %s477_s13 = scalar_lea.sflag (!%p117_p9), [#allocation3], %s135_s30  ;;  %s829_s17 = sshra.s32 (!%p117_p9), %s492_s16, 4  ;;  %s830_s17 = int_to_ptr.hbm [resolvable:$true] %s829_s17 }
  0x13   : > { %v671_v0 = vld [vmem:[%s1044_s1 + $0x8] sm:$0xff]  ;;  %v670_v1 = vld [vmem:[%s1044_s1] sm:$0xff]  ;;  %s1053_s23 = smov (!%p139_p10, %s559_s23), 63  ;;  %vm274_vm0 = vcmask 261120   ;;  %s831_s21 = scalar_lea.hbm %s830_s17, 128 }
  0x14   : > { %329 = vmatpush.bf16.msra.mxu0 %v671_v0  ;;  %768 = vmatpush.bf16.msra.mxu1 %v671_v0  ;;  %s560_s26 = sshll.u32 %s1053_s23, 2  ;;  %p832_p11 = scmp.ne.s32.totalorder %s830_s17, %s831_s21 }
  0x15   : > { %769 = vmatpush.bf16.msra.mxu2 %v671_v0  ;;  %770 = vmatpush.bf16.msra.mxu3 %v671_v0  ;;  %s954_s29 = scalar_lea.vmem %s1043_s0, %s560_s26  ;;  %s835_s24 = scalar_lea.hbm %s1045_s2, 256 }
  0x16   : > { %v654_v2 = vld [vmem:[%s954_s29] sm:$0xff]  ;;  %v655_v6 = vld [vmem:[%s954_s29 + $0x8] sm:$0xff]  ;;  %v656_v10 = vld [vmem:[%s954_s29 + $0x10] sm:$0xff]  ;;  %p833_p12 = pnand %p832_p11, %p934_p5  ;;  %p836_p0 = scmp.lt.s32.totalorder %s830_s17, %s1045_s2 }
  0x17   : > { %v658_v3 = vld [vmem:[%s954_s29 + $0x20] sm:$0xff]  ;;  %v659_v7 = vld [vmem:[%s954_s29 + $0x28] sm:$0xff]  ;;  %v660_v11 = vld [vmem:[%s954_s29 + $0x30] sm:$0xff]  ;;  %p837_p1 = scmp.lt.s32.totalorder %s835_s24, %s831_s21 }
  0x18   : > { %330 = vmatpush.bf16.msra.mxu0 %v670_v1  ;;  %771 = vmatpush.bf16.msra.mxu1 %v670_v1  ;;  %v662_v4 = vld [vmem:[%s954_s29 + $0x40] sm:$0xff]  ;;  %v663_v8 = vld [vmem:[%s954_s29 + $0x48] sm:$0xff]  ;;  %v664_v12 = vld [vmem:[%s954_s29 + $0x50] sm:$0xff]  ;;  %p834_p13 = pneg %p833_p12 }
  0x19   : > { %772 = vmatpush.bf16.msra.mxu2 %v670_v1  ;;  %773 = vmatpush.bf16.msra.mxu3 %v670_v1  ;;  %v666_v5 = vld [vmem:[%s954_s29 + $0x60] sm:$0xff]  ;;  %v667_v9 = vld [vmem:[%s954_s29 + $0x68] sm:$0xff]  ;;  %v668_v13 = vld [vmem:[%s954_s29 + $0x70] sm:$0xff]  ;;  %p838_p2 = por %p837_p1, %p836_p0 }
  0x1a   : > { %v657_v14 = vld [vmem:[%s954_s29 + $0x18] sm:$0xff] }
  0x1b   : > { %633 = vmatmul.msk.bf16.vlgmr.msra.gmra.mxu0 %vm274_vm0, %v654_v2  ;;  %637 = vmatmul.msk.bf16.vlgmr.msra.gmra.mxu1 %vm274_vm0, %v658_v3  ;;  %v661_v15 = vld [vmem:[%s954_s29 + $0x38] sm:$0xff]  ;;  %p839_p3 = pnand %p838_p2, %p834_p13 }
  0x1c   : > { %641 = vmatmul.msk.bf16.vlgmr.msra.gmra.mxu2 %vm274_vm0, %v662_v4  ;;  %645 = vmatmul.msk.bf16.vlgmr.msra.gmra.mxu3 %vm274_vm0, %v666_v5  ;;  %v665_v16 = vld [vmem:[%s954_s29 + $0x58] sm:$0xff] }
  0x1d   : > { %v669_v17 = vld [vmem:[%s954_s29 + $0x78] sm:$0xff] }
  0x2b   : > { %634 = vmatmul.msk.bf16.gmra.mxu0 %vm274_vm0, %v655_v6  ;;  %638 = vmatmul.msk.bf16.gmra.mxu1 %vm274_vm0, %v659_v7 }
  0x2c   : > { %642 = vmatmul.msk.bf16.gmra.mxu2 %vm274_vm0, %v663_v8  ;;  %646 = vmatmul.msk.bf16.gmra.mxu3 %vm274_vm0, %v667_v9 }
  0x3b   : > { %635 = vmatmul.msk.bf16.gmra.mxu0 %vm274_vm0, %v656_v10  ;;  %639 = vmatmul.msk.bf16.gmra.mxu1 %vm274_vm0, %v660_v11 }
  0x3c   : > { %643 = vmatmul.msk.bf16.gmra.mxu2 %vm274_vm0, %v664_v12  ;;  %647 = vmatmul.msk.bf16.gmra.mxu3 %vm274_vm0, %v668_v13 }
  0x4b   : > { %636 = vmatmul.msk.bf16.gmra.mxu0 %vm274_vm0, %v657_v14  ;;  %640 = vmatmul.msk.bf16.gmra.mxu1 %vm274_vm0, %v661_v15 }
  0x4c   : > { %644 = vmatmul.msk.bf16.gmra.mxu2 %vm274_vm0, %v665_v16  ;;  %648 = vmatmul.msk.bf16.gmra.mxu3 %vm274_vm0, %v669_v17 }
  0x98   : > { %v332_v18 = vpop.f32.mrf.mxu0  ;;  %v352_v19 = vpop.f32.mrf.mxu1 }
  0x9f   : > { %v372_v20 = vpop.f32.mrf.mxu2  ;;  %v392_v21 = vpop.f32.mrf.mxu3 }
  0xa0   : > { %v334_v22 = vpop.f32.mrf.mxu0  ;;  %v354_v23 = vpop.f32.mrf.mxu1 }
  0xa1   : > { %v676_v24 = vpack.c.bf16 %v334_v22, %v332_v18  ;;  %v696_v25 = vpack.c.bf16 %v354_v23, %v352_v19 }
  0xa3   : > { %677 = vst [vmem:[%s991_s4] sm:$0xff] %v676_v24  }
  0xa4   : > { %756 = vst [vmem:[%s991_s4 + $0x20] sm:$0xff] %v696_v25  }
  0xa7   : > { %v374_v26 = vpop.f32.mrf.mxu2  ;;  %v394_v27 = vpop.f32.mrf.mxu3 }
  0xa8   : > { %v716_v28 = vpack.c.bf16 %v374_v26, %v372_v20  ;;  %v736_v29 = vpack.c.bf16 %v394_v27, %v392_v21  ;;  %v337_v30 = vpop.f32.mrf.mxu0  ;;  %v357_v31 = vpop.f32.mrf.mxu1 }
  0xaa   : > { %760 = vst [vmem:[%s991_s4 + $0x40] sm:$0xff] %v716_v28  }
  0xab   : > { %764 = vst [vmem:[%s991_s4 + $0x60] sm:$0xff] %v736_v29  }
  0xaf   : > { %v377_v32 = vpop.f32.mrf.mxu2  ;;  %v397_v33 = vpop.f32.mrf.mxu3 }
  0xb0   : > { %v339_v34 = vpop.f32.mrf.mxu0  ;;  %v359_v35 = vpop.f32.mrf.mxu1 }
  0xb1   : > { %v681_v36 = vpack.c.bf16 %v339_v34, %v337_v30  ;;  %v701_v37 = vpack.c.bf16 %v359_v35, %v357_v31 }
  0xb3   : > { %753 = vst [vmem:[%s991_s4 + $0x8] sm:$0xff] %v681_v36  }
  0xb4   : > { %757 = vst [vmem:[%s991_s4 + $0x28] sm:$0xff] %v701_v37  }
  0xb7   : > { %v379_v38 = vpop.f32.mrf.mxu2  ;;  %v399_v39 = vpop.f32.mrf.mxu3 }
  0xb8   : > { %v721_v40 = vpack.c.bf16 %v379_v38, %v377_v32  ;;  %v741_v41 = vpack.c.bf16 %v399_v39, %v397_v33  ;;  %v342_v42 = vpop.f32.mrf.mxu0  ;;  %v362_v43 = vpop.f32.mrf.mxu1 }
  0xba   : > { %761 = vst [vmem:[%s991_s4 + $0x48] sm:$0xff] %v721_v40  }
  0xbb   : > { %765 = vst [vmem:[%s991_s4 + $0x68] sm:$0xff] %v741_v41  }
  0xbf   : > { %v382_v44 = vpop.f32.mrf.mxu2  ;;  %v402_v45 = vpop.f32.mrf.mxu3 }
  0xc0   : > { %v344_v46 = vpop.f32.mrf.mxu0  ;;  %v364_v47 = vpop.f32.mrf.mxu1 }
  0xc1   : > { %v686_v48 = vpack.c.bf16 %v344_v46, %v342_v42  ;;  %v706_v49 = vpack.c.bf16 %v364_v47, %v362_v43 }
  0xc3   : > { %754 = vst [vmem:[%s991_s4 + $0x10] sm:$0xff] %v686_v48  }
  0xc4   : > { %758 = vst [vmem:[%s991_s4 + $0x30] sm:$0xff] %v706_v49  }
  0xc7   : > { %v384_v50 = vpop.f32.mrf.mxu2  ;;  %v404_v51 = vpop.f32.mrf.mxu3 }
  0xc8   : > { %v726_v52 = vpack.c.bf16 %v384_v50, %v382_v44  ;;  %v746_v53 = vpack.c.bf16 %v404_v51, %v402_v45  ;;  %v347_v54 = vpop.f32.mrf.mxu0  ;;  %v367_v55 = vpop.f32.mrf.mxu1 }
  0xca   : > { %762 = vst [vmem:[%s991_s4 + $0x50] sm:$0xff] %v726_v52  }
  0xcb   : > { %766 = vst [vmem:[%s991_s4 + $0x70] sm:$0xff] %v746_v53  }
  0xcf   : > { %v387_v56 = vpop.f32.mrf.mxu2  ;;  %v407_v57 = vpop.f32.mrf.mxu3 }
  0xd0   : > { %v349_v58 = vpop.f32.mrf.mxu0  ;;  %v369_v59 = vpop.f32.mrf.mxu1 }
  0xd1   : > { %v691_v60 = vpack.c.bf16 %v349_v58, %v347_v54  ;;  %v711_v61 = vpack.c.bf16 %v369_v59, %v367_v55 }
  0xd3   : > { %755 = vst [vmem:[%s991_s4 + $0x18] sm:$0xff] %v691_v60  }
  0xd4   : > { %759 = vst [vmem:[%s991_s4 + $0x38] sm:$0xff] %v711_v61  }
  0xd7   : > { %v389_v62 = vpop.f32.mrf.mxu2  ;;  %v409_v63 = vpop.f32.mrf.mxu3 }
  0xd8   : > { %v731_v0 = vpack.c.bf16 %v389_v62, %v387_v56  ;;  %v751_v1 = vpack.c.bf16 %v409_v63, %v407_v57 }
  0xda   : > { %763 = vst [vmem:[%s991_s4 + $0x58] sm:$0xff] %v731_v0  }
  0xdb   : > { %767 = vst [vmem:[%s991_s4 + $0x78] sm:$0xff] %v751_v1  }
  0xdc   : > { %842 = shalt.err (!%p839_p3)
}
  0xdd   : > { %s879_s27 = smov 64   ;;  %s880_s28 = smov 4  }
  0xde   : > { %774 = dma.vmem_to_hbm [thread:$0]  (%p934_p5), %s490_s14, 2048, %s492_s16, %s477_s13, %s879_s27, %s879_s27, %s880_s28  }
  0xdf PF: > { %p780_p4 = scmp.ge.s32.totalorder %s877_s12, 2  ;;  %s506_s29 = sand.u32 1, %s865_s9  }
  0xe0   : > { %s507_s30 = scalar_lea.sflag [#allocation3], %s506_s29 }
  0xe1   : > { %p777_p7 = pnand %p780_p4, %p938_p6 }
  0xe3   : > { %p778_p8 = pneg %p777_p7 }
  0xe5   : > { %860 = dma.done.wait (%p778_p8), %s507_s30, 2048  }
  0xe6   : > { %862 = vsyncadd (%p778_p8), %s507_s30, 4294965248  ;;  %p12_p9 = scmp.ge.s32.totalorder %s921_s15, 4   ;;  %s1048_s9 = smov %s869_s10 }
  0xe7   : > { %s1049_s10 = smov %s873_s11  ;;  %s1050_s11 = smov %s932_s18 }
  0xe8   : > { %s1051_s12 = smov %s921_s15  ;;  %14 = sbr.rel (!%p12_p9) target bundleno = 3 (0x3), region = 63 }
  0xed   :  { %513 = vsyncpa [#allocation3], 1 }
  0xee   :  { %515 = vsyncpa [#allocation3 + $0x1], 1 }

</bundles_post_ra>
